<compile_context>
chip_gen: v6e
topology: v6e:2x2x1
jax: 0.10.0
libtpu: 0.0.40
codegen_flags: <defaults>
</compile_context>

<pallas_src>
import functools
import math

import jax
import jax.numpy as jnp
from jax.experimental import pallas as pl
from jax.experimental.pallas import tpu as pltpu


def _pair(v):
    if isinstance(v, (tuple, list)):
        return (int(v[0]), int(v[1]))
    return (int(v), int(v))


def _round_up(x, m):
    return ((x + m - 1) // m) * m


# ---------------------------------------------------------------------------
# Fused conv kernels (one grid step == one batch image).
#   x_ref : (1, C, n_in)        zero-padded image, flattened over (Hp*Wp), lanes
#   w_ref : (kh*kw, O, C)       weight tap p = (ki, kj)
#   b_ref : (O, 1)              optional bias
#   o_ref : (1, O, t_len)       lane-dense "transposed" output (spatial on lanes)
# For every tap p the needed pixels are a contiguous, statically-offset slice
# of the flat input: acc += W_p @ x[:, off_p : off_p + t_len].
# ---------------------------------------------------------------------------
def _conv_kernel_bias(x_ref, w_ref, b_ref, o_ref, *, offsets, t_len):
    n_out = o_ref.shape[1]
    x = x_ref[0]                                            # (C, n_in)
    acc = jnp.zeros((n_out, t_len), jnp.float32)
    for p, off in enumerate(offsets):                       # static unroll, kh*kw taps
        xs = x[:, off:off + t_len]                          # (C, t_len) static slice
        acc = acc + jnp.dot(w_ref[p], xs, preferred_element_type=jnp.float32)
    o_ref[0] = (acc + b_ref[...]).astype(o_ref.dtype)       # (O,1) broadcast over lanes


def _conv_kernel_nobias(x_ref, w_ref, o_ref, *, offsets, t_len):
    n_out = o_ref.shape[1]
    x = x_ref[0]
    acc = jnp.zeros((n_out, t_len), jnp.float32)
    for p, off in enumerate(offsets):
        xs = x[:, off:off + t_len]
        acc = acc + jnp.dot(w_ref[p], xs, preferred_element_type=jnp.float32)
    o_ref[0] = acc.astype(o_ref.dtype)


# ---------------------------------------------------------------------------
# Forward (PyTorch AdaptMMConvolution semantics, NCHW).
# ---------------------------------------------------------------------------
def adapt_mm_conv_forward(x, weight, bias, *, stride, padding, dilation):
    B, C, H, W = map(int, x.shape)
    O, _, kh, kw = map(int, weight.shape)
    sh, sw = stride
    ph, pw = padding
    dh, dw = dilation

    # PyTorch forward computes out_h/out_w WITHOUT dilation in the formula...
    out_h = (H + 2 * ph - (kh - 1) - 1) // sh + 1
    out_w = (W + 2 * pw - (kw - 1) - 1) // sw + 1
    # ...while Unfold uses dilation; the reference's .view() only succeeds when
    # the element counts agree — mirror that behavior explicitly.
    out_h_u = (H + 2 * ph - dh * (kh - 1) - 1) // sh + 1
    out_w_u = (W + 2 * pw - dw * (kw - 1) - 1) // sw + 1
    if out_h_u * out_w_u != out_h * out_w:
        raise ValueError(
            "AdaptMMConvolution: unfold length != out_h*out_w (the PyTorch "
            "reference .view() would also fail for these dilation settings).")

    Hp, Wp = H + 2 * ph, W + 2 * pw
    max_off = dh * (kh - 1) * Wp + dw * (kw - 1)
    t_len = _round_up(Hp * Wp, 128)            # lane-dense flat spatial extent
    n_in = _round_up(t_len + max_off, 128)     # flat input length incl. shift room

    # Zero-pad spatially and flatten (the reshape is free; the pad is one pass).
    xp = jnp.pad(x, ((0, 0), (0, 0), (ph, ph), (pw, pw)))
    xf = xp.reshape(B, C, Hp * Wp)
    xf = jnp.pad(xf, ((0, 0), (0, 0), (0, n_in - Hp * Wp)))

    # Weight per kernel tap: (kh*kw, O, C); tap order (ki outer, kj inner)
    # matches the offset order below.
    w_taps = jnp.transpose(weight, (2, 3, 0, 1)).reshape(kh * kw, O, C)
    offsets = tuple(ki * dh * Wp + kj * dw for ki in range(kh) for kj in range(kw))

    in_specs = [
        pl.BlockSpec((1, C, n_in), lambda b: (b, 0, 0)),      # per-image input
        pl.BlockSpec((kh * kw, O, C), lambda b: (0, 0, 0)),   # taps (tiny, resident)
    ]
    args = [xf, w_taps]
    if bias is not None:
        in_specs.append(pl.BlockSpec((O, 1), lambda b: (0, 0)))
        args.append(bias.reshape(O, 1).astype(jnp.float32))
        kernel = functools.partial(_conv_kernel_bias, offsets=offsets, t_len=t_len)
    else:
        kernel = functools.partial(_conv_kernel_nobias, offsets=offsets, t_len=t_len)

    # VMEM budget: double-buffered x / out blocks + taps + slice/acc slack.
    vmem_need = 4 * (2 * C * n_in + 2 * O * t_len + 2 * kh * kw * O * C
                     + kh * kw * C * t_len + O * t_len + O)
    vmem_limit = int(min(64 * 1024 * 1024, max(2 * vmem_need, 16 * 1024 * 1024)))

    cost = pl.CostEstimate(
        flops=2 * B * kh * kw * O * C * t_len,
        transcendentals=0,
        bytes_accessed=4 * (B * C * n_in + kh * kw * O * C + O + B * O * t_len),
    )

    out_flat = pl.pallas_call(
        kernel,
        out_shape=jax.ShapeDtypeStruct((B, O, t_len), x.dtype),
        grid_spec=pltpu.PrefetchScalarGridSpec(
            num_scalar_prefetch=0,
            grid=(B,),
            in_specs=in_specs,
            out_specs=pl.BlockSpec((1, O, t_len), lambda b: (b, 0, 0)),
        ),
        compiler_params=pltpu.CompilerParams(
            dimension_semantics=("parallel",),
            vmem_limit_bytes=vmem_limit,
        ),
        cost_estimate=cost,
    )(*args)

    # The flat axis covers every padded-input anchor position; valid conv
    # outputs live at rows oh*sh, cols ow*sw of the (Hp, Wp) view. Slice them
    # out (cheap, output-sized pass) and reshape to the PyTorch output view.
    z = out_flat[:, :, :Hp * Wp].reshape(B, O, Hp, Wp)
    out = z[:, :, 0:(out_h_u - 1) * sh + 1:sh, 0:(out_w_u - 1) * sw + 1:sw]
    return out.reshape(B, O, out_h, out_w)


# ---------------------------------------------------------------------------
# Module wrapper (matches the PyTorch module's parameters / init scheme)
# ---------------------------------------------------------------------------
class AdaptMMConvolutionPallas:
    def __init__(self, in_channels, out_channels, kernel_size=1, stride=1,
                 padding=0, dilation=1, bias=True, key=None):
        self.in_channels = in_channels
        self.out_channels = out_channels
        self.kernel_size = _pair(kernel_size)
        self.stride = _pair(stride)
        self.padding = _pair(padding)
        self.dilation = _pair(dilation)

        # reset_parameters(): final stdv = 1/sqrt(in_channels * kh * kw)
        n = in_channels
        stdv = 1.0
        for k in self.kernel_size:
            n *= k
            stdv = 1.0 / math.sqrt(n)

        if key is None:
            key = jax.random.PRNGKey(0)
        kw_, kb_ = jax.random.split(key)
        self.weight = jax.random.uniform(
            kw_, (out_channels, in_channels, self.kernel_size[0], self.kernel_size[1]),
            minval=-stdv, maxval=stdv, dtype=jnp.float32)
        if bias:
            self.bias = jax.random.uniform(
                kb_, (out_channels,), minval=-stdv, maxval=stdv, dtype=jnp.float32)
        else:
            self.bias = None

    def __call__(self, x):
        return adapt_mm_conv_forward(
            x, self.weight, self.bias,
            stride=self.stride, padding=self.padding, dilation=self.dilation)


# ---------------------------------------------------------------------------
# Pure-JAX reference (torch.nn.Unfold semantics) for verification only.
# ---------------------------------------------------------------------------
def unfold_nchw(x, kernel_size, dilation, padding, stride):
    kh, kw = kernel_size
    dh, dw = dilation
    ph, pw = padding
    sh, sw = stride
    B, C, H, W = x.shape
    out_h = (H + 2 * ph - dh * (kh - 1) - 1) // sh + 1
    out_w = (W + 2 * pw - dw * (kw - 1) - 1) // sw + 1
    xp = jnp.pad(x, ((0, 0), (0, 0), (ph, ph), (pw, pw)))
    patches = []
    for ki in range(kh):
        for kj in range(kw):
            hs = ki * dh
            ws = kj * dw
            sl = xp[:, :, hs:hs + (out_h - 1) * sh + 1:sh,
                          ws:ws + (out_w - 1) * sw + 1:sw]
            patches.append(sl)
    col = jnp.stack(patches, axis=2).reshape(B, C * kh * kw, out_h * out_w)
    return col, out_h, out_w


def reference_forward(module, x):
    B, C, H, W = x.shape
    O, _, kh, kw = module.weight.shape
    col, _, _ = unfold_nchw(x, (kh, kw), module.dilation, module.padding, module.stride)
    out_h = (H + 2 * module.padding[0] - (kh - 1) - 1) // module.stride[0] + 1
    out_w = (W + 2 * module.padding[1] - (kw - 1) - 1) // module.stride[1] + 1
    w2d = module.weight.reshape(O, -1)
    out = jnp.einsum('bkl,ok->bol', col, w2d)
    if module.bias is not None:
        out = out + module.bias[None, :, None]
    return out.reshape(B, O, out_h, out_w)


if __name__ == "__main__":
    key = jax.random.PRNGKey(0)
    kx, kp = jax.random.split(key)

    # Small deterministic shapes: batch=2, in_channels=4, 16x16, out_channels=8,
    # 3x3 conv, stride=1, padding=1, dilation=1.
    B, C, H, W = 2, 4, 16, 16
    O, ksz, pad = 8, 3, 1

    x = jax.random.normal(kx, (B, C, H, W), dtype=jnp.float32)

    conv = AdaptMMConvolutionPallas(C, O, kernel_size=ksz, stride=1,
                                    padding=pad, dilation=1, bias=True, key=kp)

    out = conv(x)
    out = jax.block_until_ready(out)

    ref = reference_forward(conv, x)
    assert out.shape == (B, O, H, W), out.shape
    assert jnp.allclose(out, ref, atol=1e-4, rtol=1e-4), "mismatch vs reference"

    print("KERNEL_OK")
</pallas_src>

<mosaic_0001>
module attributes {stable_mosaic.version = 11 : i64} {
  func.func @_conv_kernel_bias(%arg0: i32, %arg1: memref<1x4x512xf32, #tpu.memory_space<vmem>>, %arg2: memref<9x8x4xf32, #tpu.memory_space<vmem>>, %arg3: memref<8x1xf32, #tpu.memory_space<vmem>>, %arg4: memref<1x8x384xf32, #tpu.memory_space<vmem>>) attributes {dimension_semantics = [#tpu.dimension_semantics<parallel>], iteration_bounds = array<i64: 2>, scalar_prefetch = 0 : i64, scratch_operands = 0 : i64, tpu.core_type = #tpu.core_type<tc>, window_params = [{transform_indices = @transform_0, window_bounds = array<i64: 1, 4, 512>}, {pipeline_mode = #tpu.pipeline_mode<synchronous>, transform_indices = @transform_1, window_bounds = array<i64: 9, 8, 4>}, {pipeline_mode = #tpu.pipeline_mode<synchronous>, transform_indices = @transform_2, window_bounds = array<i64: 8, 1>}, {transform_indices = @transform_3, window_bounds = array<i64: 1, 8, 384>}]} {
    %c0 = arith.constant 0 : index
    %c0_0 = arith.constant 0 : index
    %c0_1 = arith.constant 0 : index
    %0 = vector.load %arg1[%c0, %c0_0, %c0_1] : memref<1x4x512xf32, #tpu.memory_space<vmem>>, vector<1x4x512xf32>
    %1 = vector.shape_cast %0 : vector<1x4x512xf32> to vector<4x512xf32>
    %cst = arith.constant 0.000000e+00 : f32
    %2 = vector.broadcast %cst : f32 to vector<8x384xf32>
    %3 = vector.extract_strided_slice %1 {offsets = [0, 0], sizes = [4, 384], strides = [1, 1]} : vector<4x512xf32> to vector<4x384xf32>
    %c0_2 = arith.constant 0 : index
    %c0_3 = arith.constant 0 : index
    %c0_4 = arith.constant 0 : index
    %4 = vector.load %arg2[%c0_2, %c0_3, %c0_4] : memref<9x8x4xf32, #tpu.memory_space<vmem>>, vector<1x8x4xf32>
    %5 = vector.shape_cast %4 : vector<1x8x4xf32> to vector<8x4xf32>
    %cst_5 = arith.constant dense<0.000000e+00> : vector<8x384xf32>
    %6 = tpu.matmul %5, %3, %cst_5 {dimension_numbers = #tpu.dot_dimension_numbers<[1], [0], [0], [1], [0, 0, 1, 1], [], []>} : vector<8x4xf32>, vector<4x384xf32>, vector<8x384xf32> -> vector<8x384xf32>
    %7 = arith.addf %2, %6 : vector<8x384xf32>
    %8 = vector.extract_strided_slice %1 {offsets = [0, 1], sizes = [4, 384], strides = [1, 1]} : vector<4x512xf32> to vector<4x384xf32>
    %c1 = arith.constant 1 : index
    %c0_6 = arith.constant 0 : index
    %c0_7 = arith.constant 0 : index
    %9 = vector.load %arg2[%c1, %c0_6, %c0_7] : memref<9x8x4xf32, #tpu.memory_space<vmem>>, vector<1x8x4xf32>
    %10 = vector.shape_cast %9 : vector<1x8x4xf32> to vector<8x4xf32>
    %cst_8 = arith.constant dense<0.000000e+00> : vector<8x384xf32>
    %11 = tpu.matmul %10, %8, %cst_8 {dimension_numbers = #tpu.dot_dimension_numbers<[1], [0], [0], [1], [0, 0, 1, 1], [], []>} : vector<8x4xf32>, vector<4x384xf32>, vector<8x384xf32> -> vector<8x384xf32>
    %12 = arith.addf %7, %11 : vector<8x384xf32>
    %13 = vector.extract_strided_slice %1 {offsets = [0, 2], sizes = [4, 384], strides = [1, 1]} : vector<4x512xf32> to vector<4x384xf32>
    %c2 = arith.constant 2 : index
    %c0_9 = arith.constant 0 : index
    %c0_10 = arith.constant 0 : index
    %14 = vector.load %arg2[%c2, %c0_9, %c0_10] : memref<9x8x4xf32, #tpu.memory_space<vmem>>, vector<1x8x4xf32>
    %15 = vector.shape_cast %14 : vector<1x8x4xf32> to vector<8x4xf32>
    %cst_11 = arith.constant dense<0.000000e+00> : vector<8x384xf32>
    %16 = tpu.matmul %15, %13, %cst_11 {dimension_numbers = #tpu.dot_dimension_numbers<[1], [0], [0], [1], [0, 0, 1, 1], [], []>} : vector<8x4xf32>, vector<4x384xf32>, vector<8x384xf32> -> vector<8x384xf32>
    %17 = arith.addf %12, %16 : vector<8x384xf32>
    %18 = vector.extract_strided_slice %1 {offsets = [0, 18], sizes = [4, 384], strides = [1, 1]} : vector<4x512xf32> to vector<4x384xf32>
    %c3 = arith.constant 3 : index
    %c0_12 = arith.constant 0 : index
    %c0_13 = arith.constant 0 : index
    %19 = vector.load %arg2[%c3, %c0_12, %c0_13] : memref<9x8x4xf32, #tpu.memory_space<vmem>>, vector<1x8x4xf32>
    %20 = vector.shape_cast %19 : vector<1x8x4xf32> to vector<8x4xf32>
    %cst_14 = arith.constant dense<0.000000e+00> : vector<8x384xf32>
    %21 = tpu.matmul %20, %18, %cst_14 {dimension_numbers = #tpu.dot_dimension_numbers<[1], [0], [0], [1], [0, 0, 1, 1], [], []>} : vector<8x4xf32>, vector<4x384xf32>, vector<8x384xf32> -> vector<8x384xf32>
    %22 = arith.addf %17, %21 : vector<8x384xf32>
    %23 = vector.extract_strided_slice %1 {offsets = [0, 19], sizes = [4, 384], strides = [1, 1]} : vector<4x512xf32> to vector<4x384xf32>
    %c4 = arith.constant 4 : index
    %c0_15 = arith.constant 0 : index
    %c0_16 = arith.constant 0 : index
    %24 = vector.load %arg2[%c4, %c0_15, %c0_16] : memref<9x8x4xf32, #tpu.memory_space<vmem>>, vector<1x8x4xf32>
    %25 = vector.shape_cast %24 : vector<1x8x4xf32> to vector<8x4xf32>
    %cst_17 = arith.constant dense<0.000000e+00> : vector<8x384xf32>
    %26 = tpu.matmul %25, %23, %cst_17 {dimension_numbers = #tpu.dot_dimension_numbers<[1], [0], [0], [1], [0, 0, 1, 1], [], []>} : vector<8x4xf32>, vector<4x384xf32>, vector<8x384xf32> -> vector<8x384xf32>
    %27 = arith.addf %22, %26 : vector<8x384xf32>
    %28 = vector.extract_strided_slice %1 {offsets = [0, 20], sizes = [4, 384], strides = [1, 1]} : vector<4x512xf32> to vector<4x384xf32>
    %c5 = arith.constant 5 : index
    %c0_18 = arith.constant 0 : index
    %c0_19 = arith.constant 0 : index
    %29 = vector.load %arg2[%c5, %c0_18, %c0_19] : memref<9x8x4xf32, #tpu.memory_space<vmem>>, vector<1x8x4xf32>
    %30 = vector.shape_cast %29 : vector<1x8x4xf32> to vector<8x4xf32>
    %cst_20 = arith.constant dense<0.000000e+00> : vector<8x384xf32>
    %31 = tpu.matmul %30, %28, %cst_20 {dimension_numbers = #tpu.dot_dimension_numbers<[1], [0], [0], [1], [0, 0, 1, 1], [], []>} : vector<8x4xf32>, vector<4x384xf32>, vector<8x384xf32> -> vector<8x384xf32>
    %32 = arith.addf %27, %31 : vector<8x384xf32>
    %33 = vector.extract_strided_slice %1 {offsets = [0, 36], sizes = [4, 384], strides = [1, 1]} : vector<4x512xf32> to vector<4x384xf32>
    %c6 = arith.constant 6 : index
    %c0_21 = arith.constant 0 : index
    %c0_22 = arith.constant 0 : index
    %34 = vector.load %arg2[%c6, %c0_21, %c0_22] : memref<9x8x4xf32, #tpu.memory_space<vmem>>, vector<1x8x4xf32>
    %35 = vector.shape_cast %34 : vector<1x8x4xf32> to vector<8x4xf32>
    %cst_23 = arith.constant dense<0.000000e+00> : vector<8x384xf32>
    %36 = tpu.matmul %35, %33, %cst_23 {dimension_numbers = #tpu.dot_dimension_numbers<[1], [0], [0], [1], [0, 0, 1, 1], [], []>} : vector<8x4xf32>, vector<4x384xf32>, vector<8x384xf32> -> vector<8x384xf32>
    %37 = arith.addf %32, %36 : vector<8x384xf32>
    %38 = vector.extract_strided_slice %1 {offsets = [0, 37], sizes = [4, 384], strides = [1, 1]} : vector<4x512xf32> to vector<4x384xf32>
    %c7 = arith.constant 7 : index
    %c0_24 = arith.constant 0 : index
    %c0_25 = arith.constant 0 : index
    %39 = vector.load %arg2[%c7, %c0_24, %c0_25] : memref<9x8x4xf32, #tpu.memory_space<vmem>>, vector<1x8x4xf32>
    %40 = vector.shape_cast %39 : vector<1x8x4xf32> to vector<8x4xf32>
    %cst_26 = arith.constant dense<0.000000e+00> : vector<8x384xf32>
    %41 = tpu.matmul %40, %38, %cst_26 {dimension_numbers = #tpu.dot_dimension_numbers<[1], [0], [0], [1], [0, 0, 1, 1], [], []>} : vector<8x4xf32>, vector<4x384xf32>, vector<8x384xf32> -> vector<8x384xf32>
    %42 = arith.addf %37, %41 : vector<8x384xf32>
    %43 = vector.extract_strided_slice %1 {offsets = [0, 38], sizes = [4, 384], strides = [1, 1]} : vector<4x512xf32> to vector<4x384xf32>
    %c8 = arith.constant 8 : index
    %c0_27 = arith.constant 0 : index
    %c0_28 = arith.constant 0 : index
    %44 = vector.load %arg2[%c8, %c0_27, %c0_28] : memref<9x8x4xf32, #tpu.memory_space<vmem>>, vector<1x8x4xf32>
    %45 = vector.shape_cast %44 : vector<1x8x4xf32> to vector<8x4xf32>
    %cst_29 = arith.constant dense<0.000000e+00> : vector<8x384xf32>
    %46 = tpu.matmul %45, %43, %cst_29 {dimension_numbers = #tpu.dot_dimension_numbers<[1], [0], [0], [1], [0, 0, 1, 1], [], []>} : vector<8x4xf32>, vector<4x384xf32>, vector<8x384xf32> -> vector<8x384xf32>
    %47 = arith.addf %42, %46 : vector<8x384xf32>
    %c0_30 = arith.constant 0 : index
    %c0_31 = arith.constant 0 : index
    %48 = vector.load %arg3[%c0_30, %c0_31] : memref<8x1xf32, #tpu.memory_space<vmem>>, vector<8x1xf32>
    %49 = vector.broadcast %48 : vector<8x1xf32> to vector<8x384xf32>
    %50 = arith.addf %47, %49 : vector<8x384xf32>
    %c0_32 = arith.constant 0 : index
    %c0_33 = arith.constant 0 : index
    %c0_34 = arith.constant 0 : index
    %51 = vector.load %arg4[%c0_32, %c0_33, %c0_34] : memref<1x8x384xf32, #tpu.memory_space<vmem>>, vector<1x8x384xf32>
    %52 = vector.shape_cast %51 : vector<1x8x384xf32> to vector<8x384xf32>
    %53 = vector.shape_cast %50 : vector<8x384xf32> to vector<1x8x384xf32>
    tpu.vector_store %arg4[%c0_32, %c0_33, %c0_34], %53 {strides = array<i32>} : memref<1x8x384xf32, #tpu.memory_space<vmem>>, vector<1x8x384xf32>,
    return
  }
  func.func @transform_0(%arg0: i32) -> (i32, i32, i32) {
    %c0_i32 = arith.constant 0 : i32
    %c0_i32_0 = arith.constant 0 : i32
    %c0_i32_1 = arith.constant 0 : i32
    return %arg0, %c0_i32, %c0_i32_0 : i32, i32, i32
  }
  func.func @transform_1(%arg0: i32) -> (i32, i32, i32) {
    %c0_i32 = arith.constant 0 : i32
    %c0_i32_0 = arith.constant 0 : i32
    %c0_i32_1 = arith.constant 0 : i32
    %c0_i32_2 = arith.constant 0 : i32
    return %c0_i32, %c0_i32_0, %c0_i32_1 : i32, i32, i32
  }
  func.func @transform_2(%arg0: i32) -> (i32, i32) {
    %c0_i32 = arith.constant 0 : i32
    %c0_i32_0 = arith.constant 0 : i32
    %c0_i32_1 = arith.constant 0 : i32
    return %c0_i32, %c0_i32_0 : i32, i32
  }
  func.func @transform_3(%arg0: i32) -> (i32, i32, i32) {
    %c0_i32 = arith.constant 0 : i32
    %c0_i32_0 = arith.constant 0 : i32
    %c0_i32_1 = arith.constant 0 : i32
    return %arg0, %c0_i32, %c0_i32_0 : i32, i32, i32
  }
}

</mosaic_0001>

<bundles_post_ra>
// kernel: tpu_custom_call.1
= control target key start
LH: loop header
LB: loop body
LE: loop exit
PB: predicated region body
PF: predicated region fallthrough
CT: control target
= control target key end

     0   :  { %8 = vsyncpa [#allocation3], 0  ;;  %s2259_s0 = inlined_call_operand.vmem [shape: f32[2,4,512], index: 0, kind: input, shape index: {}]   ;;  %s2260_s1 = inlined_call_operand.vmem [shape: f32[9,8,4], index: 1, kind: input, shape index: {}]   ;;  %s2261_s2 = inlined_call_operand.vmem [shape: f32[8,1], index: 2, kind: input, shape index: {}]   ;;  %s2262_s3 = inlined_call_operand.hbm [shape: f32[2,8,384], index: 3, kind: output, shape index: {}]  }
   0x1   :  { %10 = vsyncpa [#allocation3 + $0x1], 0  ;;  %s2022_s12 = smov 0   ;;  %s2024_s13 = smov 0  }
   0x2   :  { %s2026_s14 = smov 0   ;;  %s2028_s15 = smov 0  }
   0x3 LB: > { %s2043_s16 = sadd.s32 4294967295, %s1988_s15   ;;  %s1747_s17 = sadd.s32 4294967294, %s1988_s15   ;;  %s1988_s15 = sphi %s2028_s15, %s2268_s15   ;;  %s1984_s14 = sphi %s2026_s14, %s2267_s14   ;;  %s1980_s13 = sphi %s2024_s13, %s2266_s13   ;;  %s1976_s12 = sphi %s2022_s12, %s2265_s12  }
   0x4   : > { %s2047_s18 = sadd.s32 1, %s1988_s15   ;;  %s91_s19 = sadd.s32 1, %s1984_s14 }
   0x5   : > { %s88_s20 = ssub.s32 %s1988_s15, %s2047_s18  ;;  %p101_p0 = scmp.ne.s32.totalorder %s1984_s14, %s1980_s13 }
   0x6   : > { %p89_p1 = scmp.eq.s32.totalorder %s88_s20, 0  ;;  %p102_p2 = scmp.eq.s32.totalorder %s2043_s16, 1 }
   0x7   : > { %p107_p3 = scmp.ne.s32.totalorder %s1980_s13, %s1976_s12  ;;  %p108_p4 = scmp.eq.s32.totalorder %s1747_s17, 1 }
   0x8   : > { %s2058_s21 = scalar_select %p89_p1, %s1984_s14, %s91_s19  }
   0x9   : > { %p2060_p5 = por %p102_p2, %p101_p0  ;;  %p2064_p6 = por %p108_p4, %p107_p3 }
   0xa   : > { %p1750_p7 = scmp.ge.s32.totalorder %s1988_s15, 1  ;;  %p140_p8 = scmp.lt.s32.totalorder %s1988_s15, 3 }
   0xc   : > { %p141_p9 = pnand %p1750_p7, %p140_p8 }
   0xd   : > { %p164_p10 = scmp.lt.s32.totalorder (!%p141_p9), %s2043_s16, 1  ;;  %s1992_s29 = smov (!%p141_p9), 127  }
   0xe   : > { %144 = sbr.rel (%p141_p9) target bundleno = 413 (0x19d), region = 32  ;;  %s1993_s30 = smov (!%p141_p9), 126  }
   0xf   : > { %s1994_s4 = smov (!%p141_p9), 110   ;;  %s1995_s5 = smov (!%p141_p9), 109  }
  0x10   : > { %s1996_s6 = smov (!%p141_p9), 108   ;;  %s1997_s7 = smov (!%p141_p9), 92  }
  0x11   : > { %s1998_s8 = smov (!%p141_p9), 91   ;;  %s2000_s9 = smov (!%p141_p9), 90  }
  0x12   : > { %s161_s17 = sand.u32 (!%p141_p9), 1, %s1980_s13   ;;  %s1874_s20 = smul.u32 (!%p141_p9), 384, %s2043_s16 }
  0x13   : > { %v1990_v0 = vmov 0.0   ;;  %s165_s24 = scalar_select %p164_p10, %s2043_s16, 1  ;;  %vm1991_vm0 = vmmov 0   ;;  %v1999_v5 = vmov 0   ;;  %v1661_v6 = vld [vmem:[%s2261_s2] sm:$0xff]  ;;  %vm186_vm1 = vcmask 1039360  }
  0x14   : > { %265 = vmatprep.mubr.f32.mxu0 %v1990_v0  ;;  %1828 = vmatprep.subr.mxu1 %v1990_v0  ;;  %vm194_vm2 = vcmask 1043456   ;;  %v1753_v13 = vld [vmem:[%s2260_s1 + $0x8] sm:$0xff]  ;;  %vm190_vm3 = vcmask 31744   ;;  %vm502_vm4 = vcmask 1031168   ;;  %v171_v18 = vld [vmem:[%s2260_s1] sm:$0xff]  ;;  %vm669_vm5 = vcmask 900096  }
  0x15   : > { %1830 = vmatprep.mubr.msk.f32.mxu1 %vm1991_vm0, %v1990_v0  ;;  %s1809_s25 = sshll.u32 %s165_s24, 4  ;;  %1925 = vset.pattern.permute.xlu0 %v1999_v5  ;;  %v1764_v23 = vld [vmem:[%s2260_s1 + $0x10] sm:$0xff]  ;;  %v1770_v29 = vld [vmem:[%s2260_s1 + $0x18] sm:$0xff]  ;;  %vm836_vm6 = vcmask 891904   ;;  %v1776_v37 = vld [vmem:[%s2260_s1 + $0x20] sm:$0xff]  ;;  %vm1003_vm7 = vcmask 883712  }
  0x16   : > { %s168_s28 = scalar_lea.vmem %s2259_s0, %s1809_s25  ;;  %v1782_v45 = vld [vmem:[%s2260_s1 + $0x28] sm:$0xff]  ;;  %vm1170_vm8 = vcmask 752640   ;;  %v1788_v53 = vld [vmem:[%s2260_s1 + $0x30] sm:$0xff]  ;;  %vm1337_vm9 = vcmask 744448   ;;  %v1794_v61 = vld [vmem:[%s2260_s1 + $0x38] sm:$0xff]  ;;  %vm1504_vm10 = vcmask 736256  }
  0x17   : > { %v2079_v1 = vld [vmem:[%s168_s28 + $0x8] sm:$0xff]  ;;  %v2081_v2 = vld [vmem:[%s168_s28] sm:$0xff]  ;;  %s1873_s19 = smul.u32 24, %s161_s17  ;;  %s1686_s28 = scalar_lea.hbm %s2262_s3, %s1874_s20 }
  0x18   : > { %182 = vrot.lane.b32.xlu0 %v2079_v1, %s1992_s29  ;;  %178 = vrot.lane.b32.xlu1 %v2081_v2, %s1992_s29  ;;  %v176_v3 = vcombine.high %v2081_v2, %v2081_v2  ;;  %v177_v4 = vcombine.high %v2079_v1, %v2079_v1 }
  0x19   : > { %s163_s24 = scalar_lea.vmem [#allocation2], %s1873_s19 }
  0x1a   : > { %s1688_s25 = sshll.u32 %s163_s24, 4  ;;  %s1689_s25 = int_to_ptr.vmem [resolvable:$true] %s1688_s25 }
  0x1b   : > { %s1928_s16 = scalar_lea.vmem %s1689_s25, 384 }
  0x1c   : > { %498 = vrot.lane.b32.xlu1 %v2079_v1, %s1993_s30  ;;  %180 = vrot.lane.b32.xlu0 %v176_v3, %s1992_s29  ;;  %p1929_p11 = scmp.ne.s32.totalorder %s1689_s25, %s1928_s16 }
  0x1e   : > { %p1930_p12 = pnand %p1929_p11, %p2060_p5 }
  0x20   : > { %184 = vrot.lane.b32.xlu1 %v177_v4, %s1992_s29  ;;  %496 = vrot.lane.b32.xlu0 %v176_v3, %s1993_s30  ;;  %s1674_s29 = scalar_lea.sflag [#allocation3], %s161_s17  ;;  %p1931_p13 = pneg %p1930_p12 }
  0x24   : > { %500 = vrot.lane.b32.xlu1 %v177_v4, %s1993_s30  ;;  %494 = vrot.lane.b32.xlu0 %v2081_v2, %s1993_s30  ;;  %s2001_s30 = smov [#allocation2]  }
  0x28   : > { %665 = vrot.lane.b32.xlu1 %v2079_v1, %s1994_s4  ;;  %663 = vrot.lane.b32.xlu0 %v176_v3, %s1994_s4 }
  0x2c   : > { %667 = vrot.lane.b32.xlu1 %v177_v4, %s1994_s4  ;;  %661 = vrot.lane.b32.xlu0 %v2081_v2, %s1994_s4  ;;  %s1932_s4 = sshll.u32 %s2001_s30, 4  ;;  %s1933_s4 = int_to_ptr.vmem [resolvable:$false] %s1932_s4 }
  0x2d   : > { %p1935_p0 = scmp.lt.s32.totalorder %s1689_s25, %s1933_s4 }
  0x30   : > { %832 = vrot.lane.b32.xlu1 %v2079_v1, %s1995_s5  ;;  %830 = vrot.lane.b32.xlu0 %v176_v3, %s1995_s5 }
  0x34   : > { %834 = vrot.lane.b32.xlu1 %v177_v4, %s1995_s5  ;;  %828 = vrot.lane.b32.xlu0 %v2081_v2, %s1995_s5  ;;  %s1934_s5 = scalar_lea.vmem %s1933_s4, 768 }
  0x35   : > { %p1936_p1 = scmp.lt.s32.totalorder %s1934_s5, %s1928_s16 }
  0x37   : > { %p1937_p2 = por %p1936_p1, %p1935_p0 }
  0x38   : > { %999 = vrot.lane.b32.xlu1 %v2079_v1, %s1996_s6  ;;  %997 = vrot.lane.b32.xlu0 %v176_v3, %s1996_s6 }
  0x39   : > { %p1938_p3 = pnand %p1937_p2, %p1931_p13 }
  0x3c   : > { %1001 = vrot.lane.b32.xlu1 %v177_v4, %s1996_s6  ;;  %995 = vrot.lane.b32.xlu0 %v2081_v2, %s1996_s6 }
  0x40   : > { %1166 = vrot.lane.b32.xlu1 %v2079_v1, %s1997_s7  ;;  %1164 = vrot.lane.b32.xlu0 %v176_v3, %s1997_s7 }
  0x44   : > { %1168 = vrot.lane.b32.xlu1 %v177_v4, %s1997_s7  ;;  %1162 = vrot.lane.b32.xlu0 %v2081_v2, %s1997_s7 }
  0x48   : > { %1333 = vrot.lane.b32.xlu1 %v2079_v1, %s1998_s8  ;;  %1331 = vrot.lane.b32.xlu0 %v176_v3, %s1998_s8 }
  0x4c   : > { %1335 = vrot.lane.b32.xlu1 %v177_v4, %s1998_s8  ;;  %1329 = vrot.lane.b32.xlu0 %v2081_v2, %s1998_s8 }
  0x50   : > { %1500 = vrot.lane.b32.xlu1 %v2079_v1, %s2000_s9  ;;  %1498 = vrot.lane.b32.xlu0 %v176_v3, %s2000_s9 }
  0x54   : > { %1502 = vrot.lane.b32.xlu1 %v177_v4, %s2000_s9  ;;  %1496 = vrot.lane.b32.xlu0 %v2081_v2, %s2000_s9 }
  0x58   : > { %1664 = vperm.xlu0 %1925, %v1661_v6   ;;  %v1800_v6 = vld [vmem:[%s2260_s1 + $0x40] sm:$0xff] }
  0x8a   : > { %v183_v7 = vpop.permute.xlu0 %182  ;;  %v179_v8 = vpop.permute.xlu1 %178 }
  0x8e   : > { %v499_v9 = vpop.permute.xlu1 %498  ;;  %v181_v10 = vpop.permute.xlu0 %180 }
  0x8f   : > { %v188_v11 = vsel %vm186_vm1, %v181_v10, %v183_v7  ;;  %v187_v12 = vsel %vm186_vm1, %v179_v8, %v181_v10 }
  0x90   : > { %1754 = vmatprep.subr.msk.mxu0 %vm194_vm2, %v188_v11 }
  0x91   : > { %1755 = vmatpush1.msk.msra.mxu0 %vm194_vm2, %v187_v12 }
  0x92   : > { %v185_v14 = vpop.permute.xlu1 %184  ;;  %1759 = vmatprep.subr.msk.mxu0 %vm194_vm2, %v176_v3  ;;  %v497_v15 = vpop.permute.xlu0 %496  ;;  %1756 = vmatmul.mubr.msk.f32.vlgmr.msra.gmra.mxu0 %vm190_vm3, %v1753_v13 }
  0x93   : > { %v504_v16 = vsel %vm502_vm4, %v497_v15, %v499_v9  ;;  %1760 = vmatpush1.msk.msra.mxu0 %vm194_vm2, %v2081_v2  ;;  %v189_v17 = vsel %vm186_vm1, %v183_v7, %v185_v14  ;;  %415 = vmatprep.mubr.f32.mxu0 %v1990_v0 }
  0x94   : > { %1829 = vmatpush3.msk.msra.mxu1 %vm194_vm2, %v189_v17  ;;  %1765 = vmatprep.subr.msk.mxu0 %vm194_vm2, %v504_v16 }
  0x95   : > { %1831 = vmatmul.mubr.msk.f32.vlgmr.msra.gmra.mxu1 %vm190_vm3, %v1753_v13  ;;  %1833 = vmatprep.subr.mxu1 %v1990_v0 }
  0x96   : > { %v501_v19 = vpop.permute.xlu1 %500  ;;  %v495_v20 = vpop.permute.xlu0 %494  ;;  %1834 = vmatpush3.msk.msra.mxu1 %vm194_vm2, %v2079_v1  ;;  %1761 = vmatmul.mubr.msk.f32.vlgmr.msra.gmra.mxu0 %vm190_vm3, %v171_v18 }
  0x97   : > { %v505_v21 = vsel %vm502_vm4, %v499_v9, %v501_v19  ;;  %v503_v22 = vsel %vm502_vm4, %v495_v20, %v497_v15  ;;  %1835 = vmatprep.mubr.msk.f32.mxu1 %vm1991_vm0, %v1990_v0  ;;  %1838 = vmatprep.subr.mxu1 %v1990_v0 }
  0x98   : > { %1766 = vmatpush1.msk.msra.mxu0 %vm194_vm2, %v503_v22  ;;  %579 = vmatprep.mubr.f32.mxu0 %v1990_v0 }
  0x99   : > { %1836 = vmatmul.mubr.msk.f32.vlgmr.msra.gmra.mxu1 %vm190_vm3, %v171_v18 }
  0x9a   : > { %1839 = vmatpush3.msk.msra.mxu1 %vm194_vm2, %v505_v21  ;;  %v666_v24 = vpop.permute.xlu1 %665  ;;  %v664_v25 = vpop.permute.xlu0 %663  ;;  %1840 = vmatprep.mubr.msk.f32.mxu1 %vm1991_vm0, %v1990_v0 }
  0x9b   : > { %v671_v26 = vsel %vm669_vm5, %v664_v25, %v666_v24  ;;  %1843 = vmatprep.subr.mxu1 %v1990_v0  ;;  %1767 = vmatmul.mubr.msk.f32.vlgmr.msra.gmra.mxu0 %vm190_vm3, %v1764_v23 }
  0x9c   : > { %1771 = vmatprep.subr.msk.mxu0 %vm194_vm2, %v671_v26  ;;  %746 = vmatprep.mubr.f32.mxu0 %v1990_v0 }
  0x9d   : > { %1841 = vmatmul.mubr.msk.f32.vlgmr.msra.gmra.mxu1 %vm190_vm3, %v1764_v23 }
  0x9e   : > { %v668_v27 = vpop.permute.xlu1 %667  ;;  %v662_v28 = vpop.permute.xlu0 %661  ;;  %1845 = vmatprep.mubr.msk.f32.mxu1 %vm1991_vm0, %v1990_v0 }
  0x9f   : > { %v672_v30 = vsel %vm669_vm5, %v666_v24, %v668_v27  ;;  %v670_v31 = vsel %vm669_vm5, %v662_v28, %v664_v25 }
  0xa0   : > { %1772 = vmatpush1.msk.msra.mxu0 %vm194_vm2, %v670_v31  ;;  %1844 = vmatpush3.msk.msra.mxu1 %vm194_vm2, %v672_v30 }
  0xa1   : > { %1848 = vmatprep.subr.mxu1 %v1990_v0  ;;  %1773 = vmatmul.mubr.msk.f32.vlgmr.msra.gmra.mxu0 %vm190_vm3, %v1770_v29 }
  0xa2   : > { %v833_v32 = vpop.permute.xlu1 %832  ;;  %v831_v33 = vpop.permute.xlu0 %830  ;;  %1846 = vmatmul.mubr.msk.f32.vlgmr.msra.gmra.mxu1 %vm190_vm3, %v1770_v29  ;;  %913 = vmatprep.mubr.f32.mxu0 %v1990_v0 }
  0xa3   : > { %v838_v34 = vsel %vm836_vm6, %v831_v33, %v833_v32  ;;  %1850 = vmatprep.mubr.msk.f32.mxu1 %vm1991_vm0, %v1990_v0 }
  0xa4   : > { %1777 = vmatprep.subr.msk.mxu0 %vm194_vm2, %v838_v34 }
  0xa6   : > { %v835_v35 = vpop.permute.xlu1 %834  ;;  %v829_v36 = vpop.permute.xlu0 %828 }
  0xa7   : > { %v839_v38 = vsel %vm836_vm6, %v833_v32, %v835_v35  ;;  %v837_v39 = vsel %vm836_vm6, %v829_v36, %v831_v33 }
  0xa8   : > { %1778 = vmatpush1.msk.msra.mxu0 %vm194_vm2, %v837_v39  ;;  %1849 = vmatpush3.msk.msra.mxu1 %vm194_vm2, %v839_v38 }
  0xa9   : > { %1779 = vmatmul.mubr.msk.f32.vlgmr.msra.gmra.mxu0 %vm190_vm3, %v1776_v37  ;;  %1853 = vmatprep.subr.mxu1 %v1990_v0 }
  0xaa   : > { %v1000_v40 = vpop.permute.xlu1 %999  ;;  %v998_v41 = vpop.permute.xlu0 %997  ;;  %1851 = vmatmul.mubr.msk.f32.vlgmr.msra.gmra.mxu1 %vm190_vm3, %v1776_v37  ;;  %1080 = vmatprep.mubr.f32.mxu0 %v1990_v0 }
  0xab   : > { %v1005_v42 = vsel %vm1003_vm7, %v998_v41, %v1000_v40  ;;  %1855 = vmatprep.mubr.msk.f32.mxu1 %vm1991_vm0, %v1990_v0 }
  0xac   : > { %1783 = vmatprep.subr.msk.mxu0 %vm194_vm2, %v1005_v42 }
  0xae   : > { %v1002_v43 = vpop.permute.xlu1 %1001  ;;  %v996_v44 = vpop.permute.xlu0 %995 }
  0xaf   : > { %v1006_v46 = vsel %vm1003_vm7, %v1000_v40, %v1002_v43  ;;  %v1004_v47 = vsel %vm1003_vm7, %v996_v44, %v998_v41 }
  0xb0   : > { %1784 = vmatpush1.msk.msra.mxu0 %vm194_vm2, %v1004_v47  ;;  %1854 = vmatpush3.msk.msra.mxu1 %vm194_vm2, %v1006_v46 }
  0xb1   : > { %1785 = vmatmul.mubr.msk.f32.vlgmr.msra.gmra.mxu0 %vm190_vm3, %v1782_v45  ;;  %1856 = vmatmul.mubr.msk.f32.vlgmr.msra.gmra.mxu1 %vm190_vm3, %v1782_v45 }
  0xb2   : > { %v1167_v48 = vpop.permute.xlu1 %1166  ;;  %v1165_v49 = vpop.permute.xlu0 %1164  ;;  %1858 = vmatprep.subr.mxu1 %v1990_v0  ;;  %1247 = vmatprep.mubr.f32.mxu0 %v1990_v0 }
  0xb3   : > { %v1172_v50 = vsel %vm1170_vm8, %v1165_v49, %v1167_v48  ;;  %1860 = vmatprep.mubr.msk.f32.mxu1 %vm1991_vm0, %v1990_v0 }
  0xb4   : > { %1789 = vmatprep.subr.msk.mxu0 %vm194_vm2, %v1172_v50 }
  0xb6   : > { %v1169_v51 = vpop.permute.xlu1 %1168  ;;  %v1163_v52 = vpop.permute.xlu0 %1162 }
  0xb7   : > { %v1173_v54 = vsel %vm1170_vm8, %v1167_v48, %v1169_v51  ;;  %v1171_v55 = vsel %vm1170_vm8, %v1163_v52, %v1165_v49 }
  0xb8   : > { %1790 = vmatpush1.msk.msra.mxu0 %vm194_vm2, %v1171_v55  ;;  %1859 = vmatpush3.msk.msra.mxu1 %vm194_vm2, %v1173_v54 }
  0xb9   : > { %1791 = vmatmul.mubr.msk.f32.vlgmr.msra.gmra.mxu0 %vm190_vm3, %v1788_v53  ;;  %1861 = vmatmul.mubr.msk.f32.vlgmr.msra.gmra.mxu1 %vm190_vm3, %v1788_v53 }
  0xba   : > { %v1334_v56 = vpop.permute.xlu1 %1333  ;;  %v1332_v57 = vpop.permute.xlu0 %1331  ;;  %1863 = vmatprep.subr.mxu1 %v1990_v0  ;;  %1414 = vmatprep.mubr.f32.mxu0 %v1990_v0 }
  0xbb   : > { %v1339_v58 = vsel %vm1337_vm9, %v1332_v57, %v1334_v56  ;;  %1865 = vmatprep.mubr.msk.f32.mxu1 %vm1991_vm0, %v1990_v0 }
  0xbc   : > { %1795 = vmatprep.subr.msk.mxu0 %vm194_vm2, %v1339_v58 }
  0xbe   : > { %v1336_v59 = vpop.permute.xlu1 %1335  ;;  %v1330_v60 = vpop.permute.xlu0 %1329 }
  0xbf   : > { %v1340_v62 = vsel %vm1337_vm9, %v1334_v56, %v1336_v59  ;;  %v1338_v63 = vsel %vm1337_vm9, %v1330_v60, %v1332_v57 }
  0xc0   : > { %1796 = vmatpush1.msk.msra.mxu0 %vm194_vm2, %v1338_v63  ;;  %1864 = vmatpush3.msk.msra.mxu1 %vm194_vm2, %v1340_v62 }
  0xc1   : > { %1797 = vmatmul.mubr.msk.f32.vlgmr.msra.gmra.mxu0 %vm190_vm3, %v1794_v61  ;;  %1866 = vmatmul.mubr.msk.f32.vlgmr.msra.gmra.mxu1 %vm190_vm3, %v1794_v61 }
  0xc2   : > { %v1501_v1 = vpop.permute.xlu1 %1500  ;;  %v1499_v2 = vpop.permute.xlu0 %1498  ;;  %1868 = vmatprep.subr.mxu1 %v1990_v0  ;;  %1581 = vmatprep.mubr.f32.mxu0 %v1990_v0 }
  0xc3   : > { %v1506_v3 = vsel %vm1504_vm10, %v1499_v2, %v1501_v1  ;;  %1870 = vmatprep.mubr.msk.f32.mxu1 %vm1991_vm0, %v1990_v0 }
  0xc4   : > { %1801 = vmatprep.subr.msk.mxu0 %vm194_vm2, %v1506_v3 }
  0xc6   : > { %v1503_v4 = vpop.permute.xlu1 %1502  ;;  %v1497_v5 = vpop.permute.xlu0 %1496 }
  0xc7   : > { %v1507_v7 = vsel %vm1504_vm10, %v1501_v1, %v1503_v4  ;;  %v1505_v8 = vsel %vm1504_vm10, %v1497_v5, %v1499_v2 }
  0xc8   : > { %1802 = vmatpush1.msk.msra.mxu0 %vm194_vm2, %v1505_v8  ;;  %1869 = vmatpush3.msk.msra.mxu1 %vm194_vm2, %v1507_v7 }
  0xc9   : > { %1803 = vmatmul.mubr.msk.f32.vlgmr.msra.gmra.mxu0 %vm190_vm3, %v1800_v6  ;;  %1871 = vmatmul.mubr.msk.f32.vlgmr.msra.gmra.mxu1 %vm190_vm3, %v1800_v6 }
  0xd3   : > { %v1665_v60 = vpop.permute.xlu0 %1664 }
 0x152   : > { %v267_v9 = vpop.f32.mrf.mxu0 }
 0x154   : > { %v269_v0 = vpop.f32.mrf.mxu0 }
 0x155   : > { %v338_v10 = vpop.f32.mrf.mxu1 }
 0x156   : > { %v417_v11 = vpop.f32.mrf.mxu0 }
 0x157   : > { %v1832_v12 = vpop.f32.mrf.mxu1  ;;  %v418_v30 = vadd.f32 %v417_v11, %v267_v9 }
 0x158   : > { %v419_v14 = vpop.f32.mrf.mxu0 }
 0x159   : > { %v488_v13 = vpop.f32.mrf.mxu1  ;;  %v420_v33 = vadd.f32 %v419_v14, %v269_v0 }
 0x15a   : > { %v489_v31 = vadd.f32 %v488_v13, %v338_v10 }
 0x15b   : > { %v1837_v15 = vpop.f32.mrf.mxu1  ;;  %v581_v17 = vpop.f32.mrf.mxu0 }
 0x15c   : > { %v656_v34 = vadd.f32 %v581_v17, %v418_v30 }
 0x15d   : > { %v652_v16 = vpop.f32.mrf.mxu1  ;;  %v583_v20 = vpop.f32.mrf.mxu0 }
 0x15e   : > { %v658_v35 = vadd.f32 %v652_v16, %v489_v31  ;;  %v657_v39 = vadd.f32 %v583_v20, %v420_v33 }
 0x15f   : > { %v1842_v18 = vpop.f32.mrf.mxu1 }
 0x161   : > { %v748_v22 = vpop.f32.mrf.mxu0 }
 0x162   : > { %v819_v19 = vpop.f32.mrf.mxu1  ;;  %v823_v40 = vadd.f32 %v748_v22, %v656_v34 }
 0x163   : > { %v750_v24 = vpop.f32.mrf.mxu0  ;;  %v825_v41 = vadd.f32 %v819_v19, %v658_v35 }
 0x164   : > { %v1847_v21 = vpop.f32.mrf.mxu1  ;;  %v824_v43 = vadd.f32 %v750_v24, %v657_v39 }
 0x169   : > { %v915_v26 = vpop.f32.mrf.mxu0 }
 0x16a   : > { %v986_v23 = vpop.f32.mrf.mxu1  ;;  %v990_v44 = vadd.f32 %v915_v26, %v823_v40 }
 0x16b   : > { %v917_v28 = vpop.f32.mrf.mxu0  ;;  %v992_v45 = vadd.f32 %v986_v23, %v825_v41 }
 0x16c   : > { %v1852_v25 = vpop.f32.mrf.mxu1  ;;  %v991_v50 = vadd.f32 %v917_v28, %v824_v43 }
 0x171   : > { %v1153_v27 = vpop.f32.mrf.mxu1  ;;  %v1082_v32 = vpop.f32.mrf.mxu0 }
 0x172   : > { %v1157_v51 = vadd.f32 %v1082_v32, %v990_v44  ;;  %v1159_v52 = vadd.f32 %v1153_v27, %v992_v45 }
 0x173   : > { %v1857_v29 = vpop.f32.mrf.mxu1  ;;  %v1084_v37 = vpop.f32.mrf.mxu0 }
 0x174   : > { %v1158_v53 = vadd.f32 %v1084_v37, %v991_v50 }
 0x179   : > { %v1320_v36 = vpop.f32.mrf.mxu1  ;;  %v1249_v42 = vpop.f32.mrf.mxu0 }
 0x17a   : > { %v1324_v54 = vadd.f32 %v1249_v42, %v1157_v51  ;;  %v1326_v55 = vadd.f32 %v1320_v36, %v1159_v52 }
 0x17b   : > { %v1862_v38 = vpop.f32.mrf.mxu1  ;;  %v1251_v46 = vpop.f32.mrf.mxu0 }
 0x17c   : > { %v1325_v57 = vadd.f32 %v1251_v46, %v1158_v53 }
 0x181   : > { %v1487_v47 = vpop.f32.mrf.mxu1  ;;  %v1416_v48 = vpop.f32.mrf.mxu0 }
 0x182   : > { %v1491_v58 = vadd.f32 %v1416_v48, %v1324_v54  ;;  %v1493_v59 = vadd.f32 %v1487_v47, %v1326_v55 }
 0x183   : > { %v1867_v49 = vpop.f32.mrf.mxu1  ;;  %v1418_v56 = vpop.f32.mrf.mxu0 }
 0x184   : > { %v1492_v63 = vadd.f32 %v1418_v56, %v1325_v57 }
 0x189   : > { %v1583_v61 = vpop.f32.mrf.mxu0  ;;  %v1654_v62 = vpop.f32.mrf.mxu1 }
 0x18a   : > { %v1658_v1 = vadd.f32 %v1583_v61, %v1491_v58  ;;  %v1660_v2 = vadd.f32 %v1654_v62, %v1493_v59 }
 0x18b   : > { %v1585_v3 = vpop.f32.mrf.mxu0  ;;  %v1872_v4 = vpop.f32.mrf.mxu1 }
 0x18c   : > { %v1659_v5 = vadd.f32 %v1585_v3, %v1492_v63  ;;  %v1667_v6 = vadd.f32 %v1665_v60, %v1658_v1  ;;  %v1669_v7 = vadd.f32 %v1665_v60, %v1660_v2 }
 0x18e   : > { %v1668_v8 = vadd.f32 %v1665_v60, %v1659_v5  ;;  %1670 = vst [vmem:[%s163_s24] sm:$0xff] %v1667_v6  ;;  %1672 = vst [vmem:[%s163_s24 + $0x10] sm:$0xff] %v1669_v7 }
 0x190   : > { %1671 = vst [vmem:[%s163_s24 + $0x8] sm:$0xff] %v1668_v8 }
 0x191   : > { %1941 = shalt.err (!%p1938_p3)
}
 0x192   : > { %s1942_s6 = scalar_lea.hbm %s1686_s28, 384  ;;  %s1946_s9 = scalar_lea.hbm %s2262_s3, 768 }
 0x193   : > { %p1943_p4 = scmp.ne.s32.totalorder %s1686_s28, %s1942_s6  ;;  %p1947_p9 = scmp.lt.s32.totalorder %s1686_s28, %s2262_s3 }
 0x194   : > { %p1948_p10 = scmp.lt.s32.totalorder %s1946_s9, %s1942_s6 }
 0x195   : > { %p1944_p7 = pnand %p1943_p4, %p2060_p5 }
 0x196   : > { %p1949_p11 = por %p1948_p10, %p1947_p9 }
 0x197   : > { %p1945_p8 = pneg %p1944_p7 }
 0x199   : > { %p1950_p12 = pnand %p1949_p11, %p1945_p8 }
 0x19b   : > { %1953 = shalt.err (!%p1950_p12)
}
 0x19c   : > { %1875 = dma.vmem_to_hbm [thread:$0]  (%p2060_p5), %s1689_s25, 384, %s1686_s28, %s1674_s29  }
 0x19d PF: > { %p1881_p13 = scmp.ge.s32.totalorder %s1988_s15, 2  ;;  %s1700_s17 = sand.u32 1, %s1976_s12  }
 0x19e   : > { %s1701_s19 = scalar_lea.sflag [#allocation3], %s1700_s17 }
 0x19f   : > { %p1878_p0 = pnand %p1881_p13, %p2064_p6 }
 0x1a1   : > { %p1879_p1 = pneg %p1878_p0 }
 0x1a3   : > { %1971 = dma.done.wait (%p1879_p1), %s1701_s19, 384  }
 0x1a4   : > { %1973 = vsyncadd (%p1879_p1), %s1701_s19, 4294966912  ;;  %p13_p2 = scmp.ge.s32.totalorder %s2047_s18, 4   ;;  %s2265_s12 = smov %s1980_s13 }
 0x1a5   : > { %s2266_s13 = smov %s1984_s14  ;;  %s2267_s14 = smov %s2058_s21 }
 0x1a6   : > { %s2268_s15 = smov %s2047_s18  ;;  %15 = sbr.rel (!%p13_p2) target bundleno = 3 (0x3), region = 75 }
 0x1ab   :  { %1706 = vsyncpa [#allocation3], 1 }
 0x1ac   :  { %1708 = vsyncpa [#allocation3 + $0x1], 1 }

</bundles_post_ra>
